<compile_context>
chip_gen: v6e
topology: v6e:2x2x1
jax: 0.10.0
libtpu: 0.0.40
codegen_flags: <defaults>
</compile_context>

<pallas_src>
import functools

import jax
import jax.numpy as jnp
from jax.experimental import pallas as pl
from jax.experimental.pallas import tpu as pltpu

_LANES = 128
_SUBLANES = 8
_MAX_BLOCK_ROWS = 512  # 512 * 128 = 65536 elements per half per grid step


def _round_up(x, m):
    return ((x + m - 1) // m) * m


def _dpo_kernel(pol_ref, ref_ref, out_ref, *, beta, label_smoothing, ipo,
                half, rows_per_block, blocks_per_core, num_cores):
    # pol_ref/ref_ref: (2, rows_per_block, 128) native dtype,
    #                  row 0 = chosen slab, row 1 = rejected slab.
    # out_ref:         (1, 8, 128) f32 accumulator block (per core).
    c = pl.program_id(0)  # "parallel" (TensorCore) axis
    i = pl.program_id(1)  # "arbitrary" reduction axis over row blocks

    @pl.when(i == 0)
    def _():
        out_ref[...] = jnp.zeros_like(out_ref)

    pc = pol_ref[0].astype(jnp.float32)  # (rows, 128)
    pr = pol_ref[1].astype(jnp.float32)
    rc = ref_ref[0].astype(jnp.float32)
    rr = ref_ref[1].astype(jnp.float32)

    logits = (pc - pr) - (rc - rr)

    if ipo:
        losses = (logits - 1.0 / (2.0 * beta)) ** 2
    else:
        z = beta * logits
        # Stable -logsigmoid(z) = log1p(exp(-|z|)) - min(z, 0).
        # Fused identity: -logsig(z)*(1-s) - logsig(-z)*s == -logsig(z) + s*z
        losses = jnp.log1p(jnp.exp(-jnp.abs(z))) - jnp.minimum(z, 0.0)
        if label_smoothing != 0.0:
            losses = losses + label_smoothing * z

    def accumulate(vals):
        # (rows, 128) -> (rows/8, 8, 128) -> (8, 128) partial sum: stays on
        # full (8,128) vregs, no per-step cross-lane reduce.
        partial = jnp.sum(
            vals.reshape(rows_per_block // _SUBLANES, _SUBLANES, _LANES), axis=0)
        out_ref[0] = out_ref[0] + partial

    block_elems = rows_per_block * _LANES
    total_blocks = num_cores * blocks_per_core
    padded_half = total_blocks * block_elems

    if padded_half == half:
        # No padding anywhere: every block accumulates unmasked.
        accumulate(losses)
    elif total_blocks == 1:
        # Single block: it is the ragged one, mask unconditionally.
        row = jax.lax.broadcasted_iota(jnp.int32, losses.shape, 0)
        lane = jax.lax.broadcasted_iota(jnp.int32, losses.shape, 1)
        valid = (row * _LANES + lane) < half
        accumulate(jnp.where(valid, losses, 0.0))
    else:
        first_ragged = half // block_elems  # first global block with padding
        g = c * blocks_per_core + i         # global row-block index

        @pl.when(g < first_ragged)
        def _():
            accumulate(losses)

        @pl.when(g >= first_ragged)
        def _():
            base = g * block_elems
            row = jax.lax.broadcasted_iota(jnp.int32, losses.shape, 0)
            lane = jax.lax.broadcasted_iota(jnp.int32, losses.shape, 1)
            valid = (base + row * _LANES + lane) < half
            accumulate(jnp.where(valid, losses, 0.0))


def dpo_loss(policy_logps, reference_logps, *, beta, label_smoothing=0.0, ipo=False):
    """Pallas implementation of DPOLoss.forward. Returns a scalar f32."""
    assert policy_logps.shape == reference_logps.shape
    B = policy_logps.shape[0]
    assert B % 2 == 0, "DPOLoss requires an even batch (chosen/rejected pairs)"
    half = B // 2

    # TODO(synk): for tiny batches a fused XLA elementwise+reduce beats the
    # fixed pallas_call overhead; kept on the Pallas path so the kernel is
    # always exercised here.

    # Slab granularity = one full native-dtype tile (8 sublanes of 32-bit,
    # 16 of 16-bit, ...) so every slab/block sits on whole (8,128) tiles.
    itemsize = jnp.dtype(policy_logps.dtype).itemsize
    min_elems = _SUBLANES * max(1, 4 // itemsize) * _LANES

    block_elems = _MAX_BLOCK_ROWS * _LANES
    if half <= block_elems:
        padded = _round_up(half, min_elems)
        rows_per_block = padded // _LANES
        num_blocks = 1
    else:
        padded = _round_up(half, block_elems)
        rows_per_block = _MAX_BLOCK_ROWS
        num_blocks = padded // block_elems

    # Use both TensorCores (v7x) when the row blocks split evenly; on 1-TC
    # chips the "parallel" axis just iterates sequentially.
    if num_blocks >= 2 and num_blocks % 2 == 0:
        num_cores, blocks_per_core = 2, num_blocks // 2
    else:
        num_cores, blocks_per_core = 1, num_blocks

    def as_slabs(v):
        # (B,) -> (2, R, 128) [chosen; rejected], native dtype.  A free
        # reshape (no copy) when the half-batch is already tile aligned.
        if padded == half:
            return v.reshape(2, padded // _LANES, _LANES)
        pad = padded - half
        chosen = jnp.pad(v[:half], (0, pad))
        reject = jnp.pad(v[half:], (0, pad))
        return jnp.concatenate([chosen, reject]).reshape(2, padded // _LANES, _LANES)

    pol = as_slabs(policy_logps)
    ref = as_slabs(reference_logps)

    kernel = functools.partial(
        _dpo_kernel,
        beta=float(beta),
        label_smoothing=float(label_smoothing),
        ipo=bool(ipo),
        half=half,
        rows_per_block=rows_per_block,
        blocks_per_core=blocks_per_core,
        num_cores=num_cores,
    )

    in_spec = pl.BlockSpec(
        (2, rows_per_block, _LANES),
        lambda c, i: (0, c * blocks_per_core + i, 0),
    )

    partial_sums = pl.pallas_call(
        kernel,
        out_shape=jax.ShapeDtypeStruct((num_cores, _SUBLANES, _LANES), jnp.float32),
        grid_spec=pltpu.PrefetchScalarGridSpec(
            num_scalar_prefetch=0,
            grid=(num_cores, blocks_per_core),
            in_specs=[in_spec, in_spec],
            out_specs=pl.BlockSpec((1, _SUBLANES, _LANES), lambda c, i: (c, 0, 0)),
        ),
        compiler_params=pltpu.CompilerParams(
            dimension_semantics=("parallel", "arbitrary")),
    )(pol, ref)

    # One tiny final reduction (num_cores * 1024 f32) + the mean, fused by XLA.
    return jnp.sum(partial_sums) * (1.0 / half)


def _dpo_loss_ref(policy_logps, reference_logps, *, beta, label_smoothing=0.0, ipo=False):
    """Pure-JAX reference mirroring the PyTorch module."""
    B = reference_logps.shape[0]
    half = B // 2
    rc, rr = reference_logps[:half], reference_logps[half:]
    pc, pr = policy_logps[:half], policy_logps[half:]
    logits = (pc - pr) - (rc - rr)
    if ipo:
        losses = (logits - 1.0 / (2.0 * beta)) ** 2
    else:
        losses = (-jax.nn.log_sigmoid(beta * logits) * (1.0 - label_smoothing)
                  - jax.nn.log_sigmoid(-beta * logits) * label_smoothing)
    return jnp.mean(losses)


if __name__ == "__main__":
    key = jax.random.PRNGKey(0)
    k1, k2, k3, k4 = jax.random.split(key, 4)

    beta = 0.1

    # Small batch: 8 sequences' summed log-probs (first 4 chosen, last 4 rejected).
    B = 8
    policy_logps = jax.random.normal(k1, (B,), dtype=jnp.float32) * 5.0 - 20.0
    reference_logps = jax.random.normal(k2, (B,), dtype=jnp.float32) * 5.0 - 20.0

    for (ls, ipo) in [(0.05, False), (0.0, False), (0.0, True)]:
        loss = dpo_loss(policy_logps, reference_logps, beta=beta,
                        label_smoothing=ls, ipo=ipo)
        jax.block_until_ready(loss)
        loss_ref = _dpo_loss_ref(policy_logps, reference_logps, beta=beta,
                                 label_smoothing=ls, ipo=ipo)
        assert jnp.allclose(loss, loss_ref, rtol=1e-5, atol=1e-5), (ls, ipo, loss, loss_ref)

    # Native bf16 inputs: DMA'd narrow, upcast to f32 inside the kernel.
    pol_bf16 = policy_logps.astype(jnp.bfloat16)
    ref_bf16 = reference_logps.astype(jnp.bfloat16)
    loss = dpo_loss(pol_bf16, ref_bf16, beta=beta, label_smoothing=0.05)
    jax.block_until_ready(loss)
    loss_ref = _dpo_loss_ref(pol_bf16.astype(jnp.float32), ref_bf16.astype(jnp.float32),
                             beta=beta, label_smoothing=0.05)
    assert jnp.allclose(loss, loss_ref, rtol=1e-4, atol=1e-4), (loss, loss_ref)

    # Larger batch: exercises the row-block grid, the ragged-tail masking and
    # the 2-way TensorCore ("parallel") split (half = 70000 -> two 512-row blocks).
    B_big = 140_000
    policy_big = jax.random.normal(k3, (B_big,), dtype=jnp.float32) * 5.0 - 20.0
    reference_big = jax.random.normal(k4, (B_big,), dtype=jnp.float32) * 5.0 - 20.0
    loss = dpo_loss(policy_big, reference_big, beta=beta, label_smoothing=0.1)
    jax.block_until_ready(loss)
    loss_ref = _dpo_loss_ref(policy_big, reference_big, beta=beta, label_smoothing=0.1)
    assert jnp.allclose(loss, loss_ref, rtol=1e-4, atol=1e-5), (loss, loss_ref)

    print("KERNEL_OK")
</pallas_src>

<mosaic_0001>
module attributes {stable_mosaic.version = 11 : i64} {
  func.func @_dpo_kernel(%arg0: i32, %arg1: i32, %arg2: memref<2x8x128xf32, #tpu.memory_space<vmem>>, %arg3: memref<2x8x128xf32, #tpu.memory_space<vmem>>, %arg4: memref<1x8x128xf32, #tpu.memory_space<vmem>>) attributes {dimension_semantics = [#tpu.dimension_semantics<parallel>, #tpu.dimension_semantics<arbitrary>], iteration_bounds = array<i64: 1, 1>, scalar_prefetch = 0 : i64, scratch_operands = 0 : i64, tpu.core_type = #tpu.core_type<tc>, window_params = [{transform_indices = @transform_0, window_bounds = array<i64: 2, 8, 128>}, {transform_indices = @transform_1, window_bounds = array<i64: 2, 8, 128>}, {transform_indices = @transform_2, window_bounds = array<i64: 1, 8, 128>}]} {
    %c0_i32 = arith.constant 0 : i32
    %0 = arith.cmpi eq, %arg1, %c0_i32 : i32
    %1 = arith.extui %0 : i1 to i32
    %c0_i32_0 = arith.constant 0 : i32
    %2 = arith.cmpi ne, %1, %c0_i32_0 : i32
    scf.if %2 {
      %cst_22 = arith.constant 0.000000e+00 : f32
      %44 = vector.broadcast %cst_22 : f32 to vector<1x8x128xf32>
      %c0_23 = arith.constant 0 : index
      %c0_24 = arith.constant 0 : index
      %c0_25 = arith.constant 0 : index
      %45 = vector.load %arg4[%c0_23, %c0_24, %c0_25] : memref<1x8x128xf32, #tpu.memory_space<vmem>>, vector<1x8x128xf32>
      tpu.vector_store %arg4[%c0_23, %c0_24, %c0_25], %44 {strides = array<i32>} : memref<1x8x128xf32, #tpu.memory_space<vmem>>, vector<1x8x128xf32>,
    } else {
    }
    %c0 = arith.constant 0 : index
    %c0_1 = arith.constant 0 : index
    %c0_2 = arith.constant 0 : index
    %3 = vector.load %arg2[%c0, %c0_1, %c0_2] : memref<2x8x128xf32, #tpu.memory_space<vmem>>, vector<1x8x128xf32>
    %4 = vector.shape_cast %3 : vector<1x8x128xf32> to vector<8x128xf32>
    %c1 = arith.constant 1 : index
    %c0_3 = arith.constant 0 : index
    %c0_4 = arith.constant 0 : index
    %5 = vector.load %arg2[%c1, %c0_3, %c0_4] : memref<2x8x128xf32, #tpu.memory_space<vmem>>, vector<1x8x128xf32>
    %6 = vector.shape_cast %5 : vector<1x8x128xf32> to vector<8x128xf32>
    %c0_5 = arith.constant 0 : index
    %c0_6 = arith.constant 0 : index
    %c0_7 = arith.constant 0 : index
    %7 = vector.load %arg3[%c0_5, %c0_6, %c0_7] : memref<2x8x128xf32, #tpu.memory_space<vmem>>, vector<1x8x128xf32>
    %8 = vector.shape_cast %7 : vector<1x8x128xf32> to vector<8x128xf32>
    %c1_8 = arith.constant 1 : index
    %c0_9 = arith.constant 0 : index
    %c0_10 = arith.constant 0 : index
    %9 = vector.load %arg3[%c1_8, %c0_9, %c0_10] : memref<2x8x128xf32, #tpu.memory_space<vmem>>, vector<1x8x128xf32>
    %10 = vector.shape_cast %9 : vector<1x8x128xf32> to vector<8x128xf32>
    %11 = arith.subf %4, %6 : vector<8x128xf32>
    %12 = arith.subf %8, %10 : vector<8x128xf32>
    %13 = arith.subf %11, %12 : vector<8x128xf32>
    %cst = arith.constant 1.000000e-01 : f32
    %14 = vector.broadcast %cst : f32 to vector<8x128xf32>
    %15 = arith.mulf %14, %13 : vector<8x128xf32>
    %16 = math.absf %15 : vector<8x128xf32>
    %cst_11 = arith.constant 0.000000e+00 : f32
    %17 = vector.broadcast %cst_11 : f32 to vector<8x128xf32>
    %18 = arith.subf %17, %16 : vector<8x128xf32>
    %19 = math.exp %18 : vector<8x128xf32>
    %20 = math.log1p %19 : vector<8x128xf32>
    %cst_12 = arith.constant 0.000000e+00 : f32
    %21 = vector.broadcast %cst_12 : f32 to vector<8x128xf32>
    %22 = arith.minimumf %15, %21 : vector<8x128xf32>
    %23 = arith.subf %20, %22 : vector<8x128xf32>
    %cst_13 = arith.constant 5.000000e-02 : f32
    %24 = vector.broadcast %cst_13 : f32 to vector<8x128xf32>
    %25 = arith.mulf %24, %15 : vector<8x128xf32>
    %26 = arith.addf %23, %25 : vector<8x128xf32>
    %27 = tpu.iota {dimensions = array<i32: 0>} : vector<8x128xi32>
    %28 = tpu.iota {dimensions = array<i32: 1>} : vector<8x128xi32>
    %c128_i32 = arith.constant 128 : i32
    %29 = vector.broadcast %c128_i32 : i32 to vector<8x128xi32>
    %30 = arith.muli %27, %29 : vector<8x128xi32>
    %31 = arith.addi %30, %28 : vector<8x128xi32>
    %c4_i32 = arith.constant 4 : i32
    %32 = vector.broadcast %c4_i32 : i32 to vector<8x128xi32>
    %33 = arith.cmpi slt, %31, %32 : vector<8x128xi32>
    %cst_14 = arith.constant 0.000000e+00 : f32
    %34 = vector.broadcast %cst_14 : f32 to vector<8x128xf32>
    %35 = arith.select %33, %26, %34 : vector<8x128xi1>, vector<8x128xf32>
    %36 = vector.shape_cast %35 : vector<8x128xf32> to vector<1x8x128xf32>
    %cst_15 = arith.constant dense<0.000000e+00> : vector<8x128xf32>
    %37 = vector.multi_reduction <add>, %36, %cst_15 [0] : vector<1x8x128xf32> to vector<8x128xf32>
    %c0_16 = arith.constant 0 : index
    %c0_17 = arith.constant 0 : index
    %c0_18 = arith.constant 0 : index
    %38 = vector.load %arg4[%c0_16, %c0_17, %c0_18] : memref<1x8x128xf32, #tpu.memory_space<vmem>>, vector<1x8x128xf32>
    %39 = vector.shape_cast %38 : vector<1x8x128xf32> to vector<8x128xf32>
    %40 = arith.addf %39, %37 : vector<8x128xf32>
    %c0_19 = arith.constant 0 : index
    %c0_20 = arith.constant 0 : index
    %c0_21 = arith.constant 0 : index
    %41 = vector.load %arg4[%c0_19, %c0_20, %c0_21] : memref<1x8x128xf32, #tpu.memory_space<vmem>>, vector<1x8x128xf32>
    %42 = vector.shape_cast %41 : vector<1x8x128xf32> to vector<8x128xf32>
    %43 = vector.shape_cast %40 : vector<8x128xf32> to vector<1x8x128xf32>
    tpu.vector_store %arg4[%c0_19, %c0_20, %c0_21], %43 {strides = array<i32>} : memref<1x8x128xf32, #tpu.memory_space<vmem>>, vector<1x8x128xf32>,
    return
  }
  func.func @transform_0(%arg0: i32, %arg1: i32) -> (i32, i32, i32) {
    %c1_i32 = arith.constant 1 : i32
    %0 = arith.muli %arg0, %c1_i32 : i32
    %1 = arith.addi %0, %arg1 : i32
    %c0_i32 = arith.constant 0 : i32
    %c0_i32_0 = arith.constant 0 : i32
    %c0_i32_1 = arith.constant 0 : i32
    return %c0_i32, %1, %c0_i32_0 : i32, i32, i32
  }
  func.func @transform_1(%arg0: i32, %arg1: i32) -> (i32, i32, i32) {
    %c1_i32 = arith.constant 1 : i32
    %0 = arith.muli %arg0, %c1_i32 : i32
    %1 = arith.addi %0, %arg1 : i32
    %c0_i32 = arith.constant 0 : i32
    %c0_i32_0 = arith.constant 0 : i32
    %c0_i32_1 = arith.constant 0 : i32
    return %c0_i32, %1, %c0_i32_0 : i32, i32, i32
  }
  func.func @transform_2(%arg0: i32, %arg1: i32) -> (i32, i32, i32) {
    %c0_i32 = arith.constant 0 : i32
    %c0_i32_0 = arith.constant 0 : i32
    %c0_i32_1 = arith.constant 0 : i32
    return %arg0, %c0_i32, %c0_i32_0 : i32, i32, i32
  }
}

</mosaic_0001>

<bundles_post_ra>
// kernel: tpu_custom_call.1
= control target key start
LH: loop header
LB: loop body
LE: loop exit
PB: predicated region body
PF: predicated region fallthrough
CT: control target
= control target key end

     0   :  { %7 = vsyncpa [#allocation3], 0  ;;  %s213_s0 = inlined_call_operand.hbm [shape: f32[2,8,128], index: 0, kind: input, shape index: {}]   ;;  %s214_s1 = inlined_call_operand.hbm [shape: f32[2,8,128], index: 1, kind: input, shape index: {}]   ;;  %s215_s2 = inlined_call_operand.hbm [shape: f32[1,8,128], index: 2, kind: output, shape index: {}]  }
   0x1   :  { %8 = vsyncpa [#allocation6], 0 }
   0x2   :  { %9 = vsyncpa [#allocation4], 0  ;;  %s184_s9 = smov [#allocation2]  }
   0x3   :  { %s18_s10 = sshll.u32 %s184_s9, 4  ;;  %s19_s10 = int_to_ptr.vmem [resolvable:$true] %s18_s10 }
   0x4   :  { %s126_s11 = scalar_lea.vmem %s19_s10, 256  ;;  %p131_p1 = scmp.lt.s32.totalorder %s19_s10, %s19_s10 }
   0x5   :  { %p127_p0 = scmp.ne.s32.totalorder %s19_s10, %s126_s11  ;;  %p132_p2 = scmp.lt.s32.totalorder %s126_s11, %s126_s11 }
   0x7   :  { %p133_p3 = por %p132_p2, %p131_p1 }
   0x9   :  { %p134_p4 = pnand %p133_p3, %p127_p0 }
   0xb   :  { %137 = shalt.err (!%p134_p4)
}
   0xc   :  { %s185_s12 = smov 128   ;;  %s186_s13 = smov 8  }
   0xd   :  { %24 = dma.hbm_to_vmem [thread:$0]  %s213_s0, 256, %s19_s10, [#allocation3], %s185_s12, %s185_s12, %s186_s13  }
   0xe   :  { %s187_s16 = smov [#allocation5]  }
   0xf   :  { %s33_s17 = sshll.u32 %s187_s16, 4  ;;  %s34_s17 = int_to_ptr.vmem [resolvable:$true] %s33_s17 }
  0x10   :  { %s146_s18 = scalar_lea.vmem %s34_s17, 256  ;;  %p151_p6 = scmp.lt.s32.totalorder %s34_s17, %s34_s17 }
  0x11   :  { %p147_p5 = scmp.ne.s32.totalorder %s34_s17, %s146_s18  ;;  %p152_p7 = scmp.lt.s32.totalorder %s146_s18, %s146_s18 }
  0x13   :  { %p153_p8 = por %p152_p7, %p151_p6 }
  0x15   :  { %p154_p9 = pnand %p153_p8, %p147_p5 }
  0x17   :  { %157 = shalt.err (!%p154_p9)
}
  0x18   :  { %39 = dma.hbm_to_vmem [thread:$0]  %s214_s1, 256, %s34_s17, [#allocation6], %s185_s12, %s185_s12, %s186_s13  }
  0x19   :  { %178 = dma.done.wait [#allocation3], 256  }
  0x1a   :  { %179 = vsyncadd [#allocation3], 4294967040 }
  0x1b   :  { %180 = dma.done.wait [#allocation6], 256  }
  0x1c   :  { %181 = vsyncadd [#allocation6], 4294967040  ;;  %v53_v0 = vld [vmem:[#allocation2] sm:$0xff]  ;;  %v55_v1 = vld [vmem:[#allocation2 + $0x8] sm:$0xff]  ;;  %v80_v13 = vlaneseq  ;;  %s188_s0 = smov [#allocation7]  }
  0x1d   :  { %v56_v2 = vld [vmem:[#allocation5] sm:$0xff]  ;;  %v58_v3 = vld [vmem:[#allocation5 + $0x8] sm:$0xff]  ;;  %v59_v4 = vsub.f32 %v53_v0, %v55_v1  ;;  %s98_s1 = sshll.u32 %s188_s0, 4  ;;  %s99_s1 = int_to_ptr.vmem [resolvable:$true] %s98_s1 }
  0x1e   :  { %v60_v5 = vsub.f32 %v56_v2, %v58_v3  ;;  %v81_v15 = vshrl.u32 %v80_v13, 7  ;;  %v83_v18 = vand.u32 127, %v80_v13  ;;  %s158_s21 = scalar_lea.vmem %s99_s1, 128  ;;  %p163_p11 = scmp.lt.s32.totalorder %s99_s1, %s99_s1 }
  0x1f   :  { %p159_p10 = scmp.ne.s32.totalorder %s99_s1, %s158_s21  ;;  %p164_p12 = scmp.lt.s32.totalorder %s158_s21, %s158_s21 }
  0x20   :  { %v61_v6 = vsub.f32 %v59_v4, %v60_v5  ;;  %v84_v19 = vmul.u32 128, %v81_v15 }
  0x21   :  { %p165_p13 = por %p164_p12, %p163_p11 }
  0x22   :  { %v62_v7 = vmul.f32 0.1, %v61_v6  ;;  %v85_v24 = vadd.s32 %v84_v19, %v83_v18 }
  0x23   :  { %p166_p0 = pnand %p165_p13, %p159_p10 }
  0x24   :  { %v63_v8 = vand.u32 2147483647, %v62_v7  ;;  %v76_v22 = vmin.f32 %v62_v7, 0.0  ;;  %v78_v25 = vmul.f32 0.05, %v62_v7  ;;  %vm86_vm1 = vcmp.lt.s32.totalorder %v85_v24, 4 }
  0x26   :  { %v64_v9 = vsub.f32 0.0, %v63_v8 }
  0x28   :  { %v65_v10 = vmul.f32 1.442695, %v64_v9 }
  0x2a   :  { %114 = vpow2.f32 %v65_v10 }
  0x37   :  { %v115_v11 = vpop.eup %114 }
  0x38   :  { %v67_v12 = vadd.f32 1.0, %v115_v11  ;;  %v70_v14 = vmul.f32 -0.5, %v115_v11  ;;  %v73_v17 = vand.u32 2147483647, %v115_v11 }
  0x3a   :  { %116 = vlog2.f32 %v67_v12  ;;  %v71_v16 = vadd.f32 1.0, %v70_v14  ;;  %vm74_vm0 = vcmp.lt.f32.partialorder %v73_v17, 0.0004427343 }
  0x3c   :  { %v72_v20 = vmul.f32 %v115_v11, %v71_v16 }
  0x47   :  { %v117_v21 = vpop.eup %116 }
  0x48   :  { %v69_v23 = vmul.f32 0.6931472, %v117_v21 }
  0x4a   :  { %v75_v26 = vsel %vm74_vm0, %v72_v20, %v69_v23 }
  0x4b   :  { %v77_v27 = vsub.f32 %v75_v26, %v76_v22 }
  0x4d   :  { %v79_v28 = vadd.f32 %v78_v25, %v77_v27 }
  0x4f   :  { %v87_v29 = vsel %vm86_vm1, %v79_v28, 0.0 }
  0x50   :  { %91 = vst [vmem:[#allocation7] sm:$0xff] %v87_v29 }
  0x51   :  { %169 = shalt.err (!%p166_p0)
}
  0x52   :  { %101 = dma.vmem_to_hbm [thread:$0]  %s99_s1, 128, %s215_s2, [#allocation4]  }
  0x53   :  { %182 = dma.done.wait [#allocation4], 128  }
  0x54   :  { %183 = vsyncadd [#allocation4], 4294967168 }
  0x55   :  { %105 = vsyncpa [#allocation3], 1 }
  0x56   :  { %106 = vsyncpa [#allocation6], 1 }
  0x57   :  { %107 = vsyncpa [#allocation4], 1 }

</bundles_post_ra>
